<compile_context>
chip_gen: v6e
topology: v6e:2x2x1
jax: 0.10.0
libtpu: 0.0.40
codegen_flags: <defaults>
</compile_context>

<pallas_src>
import jax
import jax.numpy as jnp
from jax.experimental import pallas as pl
from jax.experimental.pallas import tpu as pltpu
import numpy as np

BN_EPS = 1e-5
NEG_BIG = -1e30   # bias for padded output columns -> exp() underflows to exactly 0
SUBLANE = 16      # bf16 packs 16 sublanes per vreg; keep batch tiles 16-aligned


def _round_up(x, m):
    return ((x + m - 1) // m) * m


# ----------------------------------------------------------------------------- kernel
def fusion_kernel(x_ref, wcat_ref, wb_ref, uw_ref, b1_ref, w2_ref, b2_ref, out_ref):
    tb = x_ref.shape[1]          # batch tile (multiple of 16)
    d = x_ref.shape[2]           # feature dim
    hp = wb_ref.shape[1]         # padded hidden dim (128)
    od = out_ref.shape[1]        # real out_dim (narrow output store)

    # (3, tb, D) -> (3*tb, D): sublane-major merge, tile-aligned for bf16 (tb % 16 == 0).
    x = x_ref[...].reshape(3 * tb, d)

    # Single fused MXU matmul: columns = [Ww | W1a' | W1b' | W1c'] (BN folded into W1').
    p = jnp.dot(x, wcat_ref[...], preferred_element_type=jnp.float32)      # (3*tb, 4*hp) f32

    # --- SelfAttention scores: tanh projection + VPU/XLU reduction (no N=1 matmul).
    # att.u bias adds the same constant to all 3 modality scores -> cancels in softmax.
    u = jnp.tanh(p[:, 0:hp] + wb_ref[...])                                  # (3*tb, hp)
    sc = jnp.sum(u * uw_ref[...], axis=-1, keepdims=True)                   # (3*tb, 1)
    s0 = sc[0:tb]
    s1 = sc[tb:2 * tb]
    s2 = sc[2 * tb:3 * tb]

    # Softmax over the modality axis, pairwise (no (B,3) lane concat); divide on EUP.
    m = jnp.maximum(jnp.maximum(s0, s1), s2)
    e0 = jnp.exp(s0 - m)
    e1 = jnp.exp(s1 - m)
    e2 = jnp.exp(s2 - m)
    inv = pl.reciprocal(e0 + e1 + e2, approx=True)
    a0 = e0 * inv
    a1 = e1 * inv
    a2 = e2 * inv                                                           # (tb, 1) each

    # h @ W1' (BN folded) -- attention scalars commute past the matmul, so the (B,3D)
    # concat never materializes.  Lane slices are 128-aligned tiles.
    z = (a0 * p[0:tb,            hp:2 * hp]
         + a1 * p[tb:2 * tb,     2 * hp:3 * hp]
         + a2 * p[2 * tb:3 * tb, 3 * hp:4 * hp])                            # (tb, hp)

    # relu(linear_1) ; dropout = identity in eval mode.
    h1 = jnp.maximum(z + b1_ref[...], 0.0)                                  # (tb, hp) f32

    # linear_2 + softmax (padded columns carry a -1e30 bias -> contribute exactly 0).
    logits = jnp.dot(h1.astype(w2_ref.dtype), w2_ref[...],
                     preferred_element_type=jnp.float32) + b2_ref[...]      # (tb, OUTP) f32
    lmax = jnp.max(logits, axis=-1, keepdims=True)
    le = jnp.exp(logits - lmax)
    probs = le * pl.reciprocal(jnp.sum(le, axis=-1, keepdims=True), approx=True)

    # Store only the real out_dim lanes (narrow masked vst) -> no padded HBM writeback.
    out_ref[...] = probs[:, 0:od]


# ----------------------------------------------------------------------------- wrapper
def _prepare_kernel_params(p, D, H, out_dim, HP, OUTP):
    """Fold eval-mode BatchNorm into linear_1, split W1 per modality, pad to 128 lanes,
    cast matmul weights to bf16 (biases stay f32 for the post-matmul VPU math)."""
    scale = p["bn_gamma"] * jax.lax.rsqrt(p["bn_var"] + BN_EPS)             # (1, 3D)
    W1f = scale.reshape(3 * D, 1) * p["W1"]                                 # (3D, H)
    b1f = p["b1"] + (p["bn_beta"] - p["bn_mean"] * scale) @ p["W1"]         # (1, H)

    def pad_cols(a, width):
        return jnp.pad(a, ((0, 0), (0, width - a.shape[1])))

    Ww_p = pad_cols(p["att_Ww"], HP)                                        # (D, HP)
    W1a = pad_cols(W1f[0:D], HP)
    W1b = pad_cols(W1f[D:2 * D], HP)
    W1c = pad_cols(W1f[2 * D:3 * D], HP)
    wcat = jnp.concatenate([Ww_p, W1a, W1b, W1c], axis=1).astype(jnp.bfloat16)  # (D, 4*HP)

    wb = pad_cols(p["att_Wb"], HP)                                          # (1, HP) f32
    uw = pad_cols(p["att_Uw"].T, HP)                                        # (1, HP) f32
    b1 = pad_cols(b1f, HP)                                                  # (1, HP) f32
    w2 = (jnp.zeros((HP, OUTP), jnp.float32)
          .at[:H, :out_dim].set(p["W2"]).astype(jnp.bfloat16))              # (HP, OUTP)
    b2 = jnp.full((1, OUTP), NEG_BIG, jnp.float32).at[:, :out_dim].set(p["b2"])
    # att_Ub is intentionally dropped: constant shift of all 3 scores cancels in softmax.
    return dict(wcat=wcat, wb=wb, uw=uw, b1=b1, w2=w2, b2=b2)


def _pick_block_b(B):
    # >=2 grid steps whenever B allows it (v7x megacore sharding), capped at 1024
    # (HBM-roofline fraction plateaus ~85% at 512-1024 row tiles).
    if B < 2 * SUBLANE:
        return _round_up(B, SUBLANE)
    return min(1024, _round_up(-(-B // 2), SUBLANE))


def _vmem_limit_bytes(block_b, D, HP, OUTP, out_dim):
    dbl = 2  # the pipeliner double-buffers every blocked input/output
    inputs = dbl * 3 * block_b * D * 2                                      # bf16 stacked x
    output = dbl * block_b * out_dim * 4                                    # f32 narrow out
    weights = dbl * ((D * 4 * HP + HP * OUTP) * 2 + (3 * HP + OUTP) * 4)    # resident weights
    temps = 4 * (3 * block_b * 4 * HP + 3 * block_b * HP                    # p, u
                 + 2 * block_b * HP + 2 * block_b * OUTP + 16 * block_b)    # z/h1, logits/le
    return min(int(1.5 * (inputs + output + weights + temps)) + (8 << 20), 64 << 20)


def fusion_forward(shared, priv_t, priv_v, params, block_b=None):
    B, D = shared.shape
    H = params["att_Ww"].shape[1]
    assert D == H, "original module only typechecks when start_size == hidden_size"
    out_dim = params["W2"].shape[1]
    HP = _round_up(H, 128)
    OUTP = _round_up(out_dim, 128)

    kp = _prepare_kernel_params(params, D, H, out_dim, HP, OUTP)

    if block_b is None:
        block_b = _pick_block_b(B)
    Bp = _round_up(B, block_b)

    # Single stacked bf16 activation stream (one DMA stream instead of three).
    x3 = jnp.stack([shared, priv_t, priv_v], axis=0).astype(jnp.bfloat16)   # (3, B, D)
    if Bp != B:
        x3 = jnp.pad(x3, ((0, 0), (0, Bp - B), (0, 0)))

    grid = (Bp // block_b,)

    def full_spec(arr):
        nd = arr.ndim
        return pl.BlockSpec(arr.shape, lambda i, _nd=nd: (0,) * _nd)        # resident weights

    flops = 2 * 3 * Bp * D * (4 * HP) + 2 * Bp * HP * OUTP
    transcendentals = 3 * Bp * HP + Bp * (3 + OUTP) + 2 * Bp
    bytes_accessed = (3 * Bp * D * 2 + (D * 4 * HP + HP * OUTP) * 2
                      + (3 * HP + OUTP) * 4 + Bp * out_dim * 4)

    out = pl.pallas_call(
        fusion_kernel,
        out_shape=jax.ShapeDtypeStruct((Bp, out_dim), jnp.float32),
        grid_spec=pltpu.PrefetchScalarGridSpec(
            num_scalar_prefetch=0,
            grid=grid,
            in_specs=[
                pl.BlockSpec((3, block_b, D), lambda i: (0, i, 0)),
                full_spec(kp["wcat"]), full_spec(kp["wb"]), full_spec(kp["uw"]),
                full_spec(kp["b1"]), full_spec(kp["w2"]), full_spec(kp["b2"]),
            ],
            out_specs=pl.BlockSpec((block_b, out_dim), lambda i: (i, 0)),
        ),
        compiler_params=pltpu.CompilerParams(
            dimension_semantics=("parallel",),
            vmem_limit_bytes=_vmem_limit_bytes(block_b, D, HP, OUTP, out_dim)),
        cost_estimate=pl.CostEstimate(
            flops=flops, transcendentals=transcendentals,
            bytes_accessed=bytes_accessed),
    )(x3, kp["wcat"], kp["wb"], kp["uw"], kp["b1"], kp["w2"], kp["b2"])

    return out[:B]


# ----------------------------------------------------------------------------- params / reference
def make_params(key, start_size, hidden_size, out_dim):
    ks = jax.random.split(key, 12)
    D, H = start_size, hidden_size
    scale = lambda fan_in: 1.0 / np.sqrt(fan_in)
    return {
        # SelfAttention(hidden_size, hidden_size); input feature dim == start_size == hidden_size
        "att_Ww": jax.random.uniform(ks[0], (H, H), jnp.float32, -scale(H), scale(H)),
        "att_Wb": jax.random.uniform(ks[1], (1, H), jnp.float32, -scale(H), scale(H)),
        "att_Uw": jax.random.uniform(ks[2], (H, 1), jnp.float32, -scale(H), scale(H)),
        "att_Ub": jax.random.uniform(ks[3], (1, 1), jnp.float32, -scale(H), scale(H)),
        # BatchNorm1d(start_size * 3), eval mode (running stats)
        "bn_gamma": jax.random.uniform(ks[4], (1, 3 * D), jnp.float32, 0.5, 1.5),
        "bn_beta": jax.random.uniform(ks[5], (1, 3 * D), jnp.float32, -0.1, 0.1),
        "bn_mean": jax.random.uniform(ks[6], (1, 3 * D), jnp.float32, -0.1, 0.1),
        "bn_var": jax.random.uniform(ks[7], (1, 3 * D), jnp.float32, 0.5, 1.5),
        # linear_1: (3D -> H)
        "W1": jax.random.uniform(ks[8], (3 * D, H), jnp.float32, -scale(3 * D), scale(3 * D)),
        "b1": jax.random.uniform(ks[9], (1, H), jnp.float32, -scale(3 * D), scale(3 * D)),
        # linear_2: (H -> out_dim)
        "W2": jax.random.uniform(ks[10], (H, out_dim), jnp.float32, -scale(H), scale(H)),
        "b2": jax.random.uniform(ks[11], (1, out_dim), jnp.float32, -scale(H), scale(H)),
    }


def reference_forward(shared, priv_t, priv_v, p):
    """Pure-JAX reference matching the PyTorch graph (eval mode), unfolded weights."""
    x = jnp.stack([shared, priv_t, priv_v], axis=1)                         # (B, 3, D)
    u = jnp.tanh(x @ p["att_Ww"] + p["att_Wb"])                             # (B, 3, H)
    sc = u @ p["att_Uw"] + p["att_Ub"]                                      # (B, 3, 1)
    a = jax.nn.softmax(sc, axis=1)
    h = (a * x).reshape(x.shape[0], -1)                                     # (B, 3D)
    y = (p["bn_gamma"] * (h - p["bn_mean"]) * jax.lax.rsqrt(p["bn_var"] + BN_EPS)
         + p["bn_beta"])
    h1 = jax.nn.relu(y @ p["W1"] + p["b1"])
    return jax.nn.softmax(h1 @ p["W2"] + p["b2"], axis=-1)


# ----------------------------------------------------------------------------- main
if __name__ == "__main__":
    B = 8
    start_size = 32      # must equal hidden_size for the original module to typecheck
    hidden_size = 32
    out_dim = 8

    key = jax.random.PRNGKey(0)
    k_in, k_p = jax.random.split(key)
    k1, k2, k3 = jax.random.split(k_in, 3)
    shared = jax.random.normal(k1, (B, start_size), jnp.float32)
    priv_t = jax.random.normal(k2, (B, start_size), jnp.float32)
    priv_v = jax.random.normal(k3, (B, start_size), jnp.float32)

    params = make_params(k_p, start_size, hidden_size, out_dim)

    out = fusion_forward(shared, priv_t, priv_v, params)
    out = jax.block_until_ready(out)

    ref = reference_forward(shared, priv_t, priv_v, params)
    # Tolerance note: activations/weights are deliberately quantized to bf16 for the
    # MXU passes (f32 accumulation) and the softmax reciprocals run on the EUP approx
    # path, so the kernel and the f32 XLA reference round differently at the
    # ~1e-3..1e-2 level on softmax outputs; genuine logic errors would show up as
    # O(0.1-1) discrepancies.
    np.testing.assert_allclose(np.asarray(out), np.asarray(ref), rtol=3e-2, atol=2e-2)
    assert out.shape == (B, out_dim)
    assert np.all(np.asarray(out) >= 0.0)
    np.testing.assert_allclose(np.asarray(out).sum(axis=-1), np.ones(B), rtol=0, atol=5e-3)

    print("KERNEL_OK")
</pallas_src>

<mosaic_0001>
module attributes {stable_mosaic.version = 11 : i64} {
  func.func @fusion_kernel(%arg0: i32, %arg1: memref<3x16x32xbf16, #tpu.memory_space<vmem>>, %arg2: memref<32x512xbf16, #tpu.memory_space<vmem>>, %arg3: memref<1x128xf32, #tpu.memory_space<vmem>>, %arg4: memref<1x128xf32, #tpu.memory_space<vmem>>, %arg5: memref<1x128xf32, #tpu.memory_space<vmem>>, %arg6: memref<128x128xbf16, #tpu.memory_space<vmem>>, %arg7: memref<1x128xf32, #tpu.memory_space<vmem>>, %arg8: memref<16x8xf32, #tpu.memory_space<vmem>>) attributes {dimension_semantics = [#tpu.dimension_semantics<parallel>], iteration_bounds = array<i64: 1>, scalar_prefetch = 0 : i64, scratch_operands = 0 : i64, tpu.core_type = #tpu.core_type<tc>, window_params = [{transform_indices = @transform_0, window_bounds = array<i64: 3, 16, 32>}, {pipeline_mode = #tpu.pipeline_mode<synchronous>, transform_indices = @transform_1, window_bounds = array<i64: 32, 512>}, {pipeline_mode = #tpu.pipeline_mode<synchronous>, transform_indices = @transform_2, window_bounds = array<i64: 1, 128>}, {pipeline_mode = #tpu.pipeline_mode<synchronous>, transform_indices = @transform_3, window_bounds = array<i64: 1, 128>}, {pipeline_mode = #tpu.pipeline_mode<synchronous>, transform_indices = @transform_4, window_bounds = array<i64: 1, 128>}, {pipeline_mode = #tpu.pipeline_mode<synchronous>, transform_indices = @transform_5, window_bounds = array<i64: 128, 128>}, {pipeline_mode = #tpu.pipeline_mode<synchronous>, transform_indices = @transform_6, window_bounds = array<i64: 1, 128>}, {transform_indices = @transform_7, window_bounds = array<i64: 16, 8>}]} {
    %c0 = arith.constant 0 : index
    %c0_0 = arith.constant 0 : index
    %c0_1 = arith.constant 0 : index
    %0 = vector.load %arg1[%c0, %c0_0, %c0_1] : memref<3x16x32xbf16, #tpu.memory_space<vmem>>, vector<3x16x32xbf16>
    %1 = vector.shape_cast %0 : vector<3x16x32xbf16> to vector<48x32xbf16>
    %c0_2 = arith.constant 0 : index
    %c0_3 = arith.constant 0 : index
    %2 = vector.load %arg2[%c0_2, %c0_3] : memref<32x512xbf16, #tpu.memory_space<vmem>>, vector<32x512xbf16>
    %cst = arith.constant dense<0.000000e+00> : vector<48x512xf32>
    %3 = tpu.matmul %1, %2, %cst {dimension_numbers = #tpu.dot_dimension_numbers<[1], [0], [0], [1], [0, 0, 1, 1], [], []>} : vector<48x32xbf16>, vector<32x512xbf16>, vector<48x512xf32> -> vector<48x512xf32>
    %4 = vector.extract_strided_slice %3 {offsets = [0, 0], sizes = [48, 128], strides = [1, 1]} : vector<48x512xf32> to vector<48x128xf32>
    %c0_4 = arith.constant 0 : index
    %c0_5 = arith.constant 0 : index
    %5 = vector.load %arg3[%c0_4, %c0_5] : memref<1x128xf32, #tpu.memory_space<vmem>>, vector<1x128xf32>
    %6 = vector.broadcast %5 : vector<1x128xf32> to vector<48x128xf32>
    %7 = arith.addf %4, %6 : vector<48x128xf32>
    %8 = math.tanh %7 : vector<48x128xf32>
    %c0_6 = arith.constant 0 : index
    %c0_7 = arith.constant 0 : index
    %9 = vector.load %arg4[%c0_6, %c0_7] : memref<1x128xf32, #tpu.memory_space<vmem>>, vector<1x128xf32>
    %10 = vector.broadcast %9 : vector<1x128xf32> to vector<48x128xf32>
    %11 = arith.mulf %8, %10 : vector<48x128xf32>
    %cst_8 = arith.constant dense<0.000000e+00> : vector<48xf32>
    %12 = vector.multi_reduction <add>, %11, %cst_8 [1] : vector<48x128xf32> to vector<48xf32>
    %13 = vector.shape_cast %12 : vector<48xf32> to vector<48x1xf32>
    %14 = vector.extract_strided_slice %13 {offsets = [0, 0], sizes = [16, 1], strides = [1, 1]} : vector<48x1xf32> to vector<16x1xf32>
    %15 = vector.extract_strided_slice %13 {offsets = [16, 0], sizes = [16, 1], strides = [1, 1]} : vector<48x1xf32> to vector<16x1xf32>
    %16 = vector.extract_strided_slice %13 {offsets = [32, 0], sizes = [16, 1], strides = [1, 1]} : vector<48x1xf32> to vector<16x1xf32>
    %17 = arith.maximumf %14, %15 : vector<16x1xf32>
    %18 = arith.maximumf %17, %16 : vector<16x1xf32>
    %19 = arith.subf %14, %18 : vector<16x1xf32>
    %20 = math.exp %19 : vector<16x1xf32>
    %21 = arith.subf %15, %18 : vector<16x1xf32>
    %22 = math.exp %21 : vector<16x1xf32>
    %23 = arith.subf %16, %18 : vector<16x1xf32>
    %24 = math.exp %23 : vector<16x1xf32>
    %25 = arith.addf %20, %22 : vector<16x1xf32>
    %26 = arith.addf %25, %24 : vector<16x1xf32>
    %27 = tpu.reciprocal %26 {approx = true} : vector<16x1xf32> -> vector<16x1xf32>
    %28 = arith.mulf %20, %27 : vector<16x1xf32>
    %29 = arith.mulf %22, %27 : vector<16x1xf32>
    %30 = arith.mulf %24, %27 : vector<16x1xf32>
    %31 = vector.extract_strided_slice %3 {offsets = [0, 128], sizes = [16, 128], strides = [1, 1]} : vector<48x512xf32> to vector<16x128xf32>
    %32 = vector.broadcast %28 : vector<16x1xf32> to vector<16x128xf32>
    %33 = arith.mulf %32, %31 : vector<16x128xf32>
    %34 = vector.extract_strided_slice %3 {offsets = [16, 256], sizes = [16, 128], strides = [1, 1]} : vector<48x512xf32> to vector<16x128xf32>
    %35 = vector.broadcast %29 : vector<16x1xf32> to vector<16x128xf32>
    %36 = arith.mulf %35, %34 : vector<16x128xf32>
    %37 = arith.addf %33, %36 : vector<16x128xf32>
    %38 = vector.extract_strided_slice %3 {offsets = [32, 384], sizes = [16, 128], strides = [1, 1]} : vector<48x512xf32> to vector<16x128xf32>
    %39 = vector.broadcast %30 : vector<16x1xf32> to vector<16x128xf32>
    %40 = arith.mulf %39, %38 : vector<16x128xf32>
    %41 = arith.addf %37, %40 : vector<16x128xf32>
    %c0_9 = arith.constant 0 : index
    %c0_10 = arith.constant 0 : index
    %42 = vector.load %arg5[%c0_9, %c0_10] : memref<1x128xf32, #tpu.memory_space<vmem>>, vector<1x128xf32>
    %43 = vector.broadcast %42 : vector<1x128xf32> to vector<16x128xf32>
    %44 = arith.addf %41, %43 : vector<16x128xf32>
    %cst_11 = arith.constant 0.000000e+00 : f32
    %45 = vector.broadcast %cst_11 : f32 to vector<16x128xf32>
    %46 = arith.maximumf %44, %45 : vector<16x128xf32>
    %47 = arith.truncf %46 : vector<16x128xf32> to vector<16x128xbf16>
    %c0_12 = arith.constant 0 : index
    %c0_13 = arith.constant 0 : index
    %48 = vector.load %arg6[%c0_12, %c0_13] : memref<128x128xbf16, #tpu.memory_space<vmem>>, vector<128x128xbf16>
    %cst_14 = arith.constant dense<0.000000e+00> : vector<16x128xf32>
    %49 = tpu.matmul %47, %48, %cst_14 {dimension_numbers = #tpu.dot_dimension_numbers<[1], [0], [0], [1], [0, 0, 1, 1], [], []>} : vector<16x128xbf16>, vector<128x128xbf16>, vector<16x128xf32> -> vector<16x128xf32>
    %c0_15 = arith.constant 0 : index
    %c0_16 = arith.constant 0 : index
    %50 = vector.load %arg7[%c0_15, %c0_16] : memref<1x128xf32, #tpu.memory_space<vmem>>, vector<1x128xf32>
    %51 = vector.broadcast %50 : vector<1x128xf32> to vector<16x128xf32>
    %52 = arith.addf %49, %51 : vector<16x128xf32>
    %cst_17 = arith.constant dense<0xFF800000> : vector<16xf32>
    %53 = vector.multi_reduction <maximumf>, %52, %cst_17 [1] : vector<16x128xf32> to vector<16xf32>
    %54 = vector.shape_cast %53 : vector<16xf32> to vector<16x1xf32>
    %55 = vector.broadcast %54 : vector<16x1xf32> to vector<16x128xf32>
    %56 = arith.subf %52, %55 : vector<16x128xf32>
    %57 = math.exp %56 : vector<16x128xf32>
    %cst_18 = arith.constant dense<0.000000e+00> : vector<16xf32>
    %58 = vector.multi_reduction <add>, %57, %cst_18 [1] : vector<16x128xf32> to vector<16xf32>
    %59 = vector.shape_cast %58 : vector<16xf32> to vector<16x1xf32>
    %60 = tpu.reciprocal %59 {approx = true} : vector<16x1xf32> -> vector<16x1xf32>
    %61 = vector.broadcast %60 : vector<16x1xf32> to vector<16x128xf32>
    %62 = arith.mulf %57, %61 : vector<16x128xf32>
    %63 = vector.extract_strided_slice %62 {offsets = [0, 0], sizes = [16, 8], strides = [1, 1]} : vector<16x128xf32> to vector<16x8xf32>
    %c0_19 = arith.constant 0 : index
    %c0_20 = arith.constant 0 : index
    %64 = vector.load %arg8[%c0_19, %c0_20] : memref<16x8xf32, #tpu.memory_space<vmem>>, vector<16x8xf32>
    tpu.vector_store %arg8[%c0_19, %c0_20], %63 {strides = array<i32>} : memref<16x8xf32, #tpu.memory_space<vmem>>, vector<16x8xf32>,
    return
  }
  func.func @transform_0(%arg0: i32) -> (i32, i32, i32) {
    %c0_i32 = arith.constant 0 : i32
    %c0_i32_0 = arith.constant 0 : i32
    %c0_i32_1 = arith.constant 0 : i32
    return %c0_i32, %arg0, %c0_i32_0 : i32, i32, i32
  }
  func.func @transform_1(%arg0: i32) -> (i32, i32) {
    %c0_i32 = arith.constant 0 : i32
    %c0_i32_0 = arith.constant 0 : i32
    %c0_i32_1 = arith.constant 0 : i32
    return %c0_i32, %c0_i32_0 : i32, i32
  }
  func.func @transform_2(%arg0: i32) -> (i32, i32) {
    %c0_i32 = arith.constant 0 : i32
    %c0_i32_0 = arith.constant 0 : i32
    %c0_i32_1 = arith.constant 0 : i32
    return %c0_i32, %c0_i32_0 : i32, i32
  }
  func.func @transform_3(%arg0: i32) -> (i32, i32) {
    %c0_i32 = arith.constant 0 : i32
    %c0_i32_0 = arith.constant 0 : i32
    %c0_i32_1 = arith.constant 0 : i32
    return %c0_i32, %c0_i32_0 : i32, i32
  }
  func.func @transform_4(%arg0: i32) -> (i32, i32) {
    %c0_i32 = arith.constant 0 : i32
    %c0_i32_0 = arith.constant 0 : i32
    %c0_i32_1 = arith.constant 0 : i32
    return %c0_i32, %c0_i32_0 : i32, i32
  }
  func.func @transform_5(%arg0: i32) -> (i32, i32) {
    %c0_i32 = arith.constant 0 : i32
    %c0_i32_0 = arith.constant 0 : i32
    %c0_i32_1 = arith.constant 0 : i32
    return %c0_i32, %c0_i32_0 : i32, i32
  }
  func.func @transform_6(%arg0: i32) -> (i32, i32) {
    %c0_i32 = arith.constant 0 : i32
    %c0_i32_0 = arith.constant 0 : i32
    %c0_i32_1 = arith.constant 0 : i32
    return %c0_i32, %c0_i32_0 : i32, i32
  }
  func.func @transform_7(%arg0: i32) -> (i32, i32) {
    %c0_i32 = arith.constant 0 : i32
    %c0_i32_0 = arith.constant 0 : i32
    return %arg0, %c0_i32 : i32, i32
  }
}

</mosaic_0001>

<bundles_post_ra>
// kernel: tpu_custom_call.1
= control target key start
LH: loop header
LB: loop body
LE: loop exit
PB: predicated region body
PF: predicated region fallthrough
CT: control target
= control target key end

     0   :  { %12 = vsyncpa [#allocation3], 0  ;;  %s789_s0 = inlined_call_operand.hbm [shape: bf16[3,16,32], index: 0, kind: input, shape index: {}]   ;;  %s790_s1 = inlined_call_operand.hbm [shape: bf16[32,512], index: 1, kind: input, shape index: {}]   ;;  %s791_s2 = inlined_call_operand.vmem [shape: f32[1,128], index: 2, kind: input, shape index: {}]   ;;  %s792_s3 = inlined_call_operand.vmem [shape: f32[1,128], index: 3, kind: input, shape index: {}]   ;;  %s793_s4 = inlined_call_operand.vmem [shape: f32[1,128], index: 4, kind: input, shape index: {}]   ;;  %s794_s5 = inlined_call_operand.hbm [shape: bf16[128,128], index: 5, kind: input, shape index: {}]   ;;  %s795_s6 = inlined_call_operand.vmem [shape: f32[1,128], index: 6, kind: input, shape index: {}]   ;;  %s796_s7 = inlined_call_operand.vmem [shape: f32[16,8], index: 7, kind: output, shape index: {}]  }
   0x1   :  { %13 = vsyncpa [#allocation5], 0  ;;  %s691_s24 = smov [#allocation4]  }
   0x2   :  { %s31_s25 = sshll.u32 %s691_s24, 4  ;;  %s32_s25 = int_to_ptr.vmem [resolvable:$true] %s31_s25 }
   0x3   :  { %s635_s26 = scalar_lea.vmem %s32_s25, 1024  ;;  %p640_p1 = scmp.lt.s32.totalorder %s32_s25, %s32_s25 }
   0x4   :  { %p636_p0 = scmp.ne.s32.totalorder %s32_s25, %s635_s26  ;;  %p641_p2 = scmp.lt.s32.totalorder %s635_s26, %s635_s26 }
   0x6   :  { %p642_p3 = por %p641_p2, %p640_p1 }
   0x8   :  { %p643_p4 = pnand %p642_p3, %p636_p0 }
   0xa   :  { %646 = shalt.err (!%p643_p4)
}
   0xb   :  { %s692_s27 = smov 256   ;;  %s693_s28 = smov 16  }
   0xc   :  { %37 = dma.hbm_to_vmem [thread:$0]  %s790_s1, 1024, %s32_s25, [#allocation5], %s692_s27, %s692_s27, %s693_s28  }
   0xd   :  { %s694_s8 = smov [#allocation2]  }
   0xe   :  { %s19_s9 = sshll.u32 %s694_s8, 4  ;;  %s20_s9 = int_to_ptr.vmem [resolvable:$true] %s19_s9 }
   0xf   :  { %s655_s10 = scalar_lea.vmem %s20_s9, 384  ;;  %p660_p6 = scmp.lt.s32.totalorder %s20_s9, %s20_s9 }
  0x10   :  { %p656_p5 = scmp.ne.s32.totalorder %s20_s9, %s655_s10  ;;  %p661_p7 = scmp.lt.s32.totalorder %s655_s10, %s655_s10 }
  0x12   :  { %p662_p8 = por %p661_p7, %p660_p6 }
  0x14   :  { %p663_p9 = pnand %p662_p8, %p656_p5 }
  0x16   :  { %666 = shalt.err (!%p663_p9)
}
  0x17   :  { %s695_s11 = smov 64   ;;  %s696_s12 = smov 4  }
  0x18   :  { %25 = dma.hbm_to_vmem [thread:$0]  %s789_s0, 384, %s20_s9, [#allocation3], %s695_s11, %s695_s11, %s696_s12  }
  0x19   :  { %s697_s15 = smov [#allocation6]  }
  0x1a   :  { %s49_s16 = sshll.u32 %s697_s15, 4  ;;  %s50_s16 = int_to_ptr.vmem [resolvable:$true] %s49_s16 }
  0x1b   :  { %s675_s1 = scalar_lea.vmem %s50_s16, 1024  ;;  %p680_p11 = scmp.lt.s32.totalorder %s50_s16, %s50_s16 }
  0x1c   :  { %p676_p10 = scmp.ne.s32.totalorder %s50_s16, %s675_s1  ;;  %p681_p12 = scmp.lt.s32.totalorder %s675_s1, %s675_s1 }
  0x1e   :  { %p682_p13 = por %p681_p12, %p680_p11 }
  0x20   :  { %p683_p0 = pnand %p682_p13, %p676_p10 }
  0x22   :  { %686 = shalt.err (!%p683_p0)
}
  0x23   :  { %55 = dma.hbm_to_vmem [thread:$0]  %s794_s5, 1024, %s50_s16, [#allocation5], %s695_s11, %s695_s11, %s696_s12  }
  0x24   :  { %687 = dma.done.wait [#allocation3], 384  }
  0x25   :  { %688 = vsyncadd [#allocation3], 4294966912 }
  0x26   :  { %689 = dma.done.wait [#allocation5], 2048  }
  0x27   :  { %690 = vsyncadd [#allocation5], 4294965248  ;;  %v698_v0 = vmov 0   ;;  %v568_v1 = vld [vmem:[#allocation4 + $0x24] ss:$16 sps:$4 sm:$0xff]   ;;  %v574_v5 = vld [vmem:[#allocation2] sm:$0xff]  }
  0x28   :  { %179 = vmatprep.mubr.bf16.mxu0 %v698_v0  ;;  %238 = vmatprep.mubr.bf16.mxu1 %v698_v0  ;;  %v570_v2 = vld [vmem:[#allocation4 + $0x20] ss:$16 sps:$4 sm:$0xff]   ;;  %v571_v3 = vld [vmem:[#allocation4 + $0x4] ss:$16 sps:$4 sm:$0xff]   ;;  %v577_v6 = vld [vmem:[#allocation4 + $0x2c] ss:$16 sps:$4 sm:$0xff]  }
  0x29   :  { %159 = vmatprep.subr.bf16.mxu0 %v568_v1  ;;  %v573_v4 = vld [vmem:[#allocation4] ss:$16 sps:$4 sm:$0xff]   ;;  %v579_v7 = vld [vmem:[#allocation4 + $0x28] ss:$16 sps:$4 sm:$0xff]   ;;  %vm137_vm0 = vcmask 261120   ;;  %218 = vmatprep.subr.bf16.mxu1 %v577_v6  ;;  %v699_v49 = vmov 0.0  }
  0x2a   :  { %160 = vmatpush1.bf16.msra.mxu0 %v570_v2  ;;  %v580_v8 = vld [vmem:[#allocation4 + $0xc] ss:$16 sps:$4 sm:$0xff]   ;;  %v582_v9 = vld [vmem:[#allocation4 + $0x8] ss:$16 sps:$4 sm:$0xff]   ;;  %219 = vmatpush1.bf16.msra.mxu1 %v579_v7  ;;  %v575_v10 = vld [vmem:[#allocation2 + $0x8] sm:$0xff]   ;;  %vm700_vm1 = vmmov 0  }
  0x2b   :  { %161 = vmatprep.subr.bf16.mxu0 %v571_v3  ;;  %220 = vmatprep.subr.bf16.mxu1 %v580_v8  ;;  %v576_v11 = vld [vmem:[#allocation2 + $0x10] sm:$0xff]   ;;  %v517_v12 = vld [vmem:[%s791_s2] ss:$0 sm:$0xff]  ;;  %v584_v52 = vld [vmem:[#allocation6 + $0x30] sm:$0xff]   ;;  %vm491_vm2 = vcmask 64512  }
  0x2c   :  { %v518_v29 = vld [vmem:[%s792_s3] ss:$0 sm:$0xff]  ;;  %v583_v48 = vld [vmem:[#allocation6 + $0x38] sm:$0xff]   ;;  %v586_v58 = vld [vmem:[#allocation6 + $0x20] sm:$0xff]  }
  0x2d   :  { %v585_v55 = vld [vmem:[#allocation6 + $0x28] sm:$0xff]   ;;  %v587_v60 = vld [vmem:[#allocation6 + $0x18] sm:$0xff]   ;;  %v588_v61 = vld [vmem:[#allocation6 + $0x10] sm:$0xff]  }
  0x2e   :  { %162 = vmatpush1.bf16.msra.mxu0 %v573_v4  ;;  %221 = vmatpush1.bf16.msra.mxu1 %v582_v9  ;;  %v589_v62 = vld [vmem:[#allocation6 + $0x8] sm:$0xff]   ;;  %v590_v63 = vld [vmem:[#allocation6] sm:$0xff]  }
  0x2f   :  { %538 = vmatprep.subr.bf16.mxu0 %v699_v49 }
  0x31   :  { %511 = vmatmul.mubr.msk.bf16.vlgmr.msra.gmra.mxu0 %vm137_vm0, %v574_v5  ;;  %514 = vmatmul.mubr.msk.bf16.vlgmr.msra.gmra.mxu1 %vm137_vm0, %v574_v5 }
  0x32   :  { %189 = vmatprep.mubr.bf16.mxu0 %v698_v0  ;;  %244 = vmatprep.mubr.bf16.mxu1 %v698_v0 }
  0x33   :  { %539 = vmatpush3.bf16.msra.mxu0 %v583_v48 }
  0x34   :  { %540 = vmatprep.subr.bf16.mxu0 %v699_v49 }
  0x37   :  { %541 = vmatpush3.bf16.msra.mxu0 %v584_v52 }
  0x38   :  { %542 = vmatprep.subr.bf16.mxu0 %v699_v49 }
  0x39   :  { %512 = vmatmul.mubr.msk.bf16.gmra.mxu0 %vm137_vm0, %v575_v10  ;;  %515 = vmatmul.mubr.msk.bf16.gmra.mxu1 %vm137_vm0, %v575_v10 }
  0x3a   :  { %197 = vmatprep.mubr.bf16.mxu0 %v698_v0  ;;  %252 = vmatprep.mubr.bf16.mxu1 %v698_v0 }
  0x3b   :  { %543 = vmatpush3.bf16.msra.mxu0 %v585_v55 }
  0x3c   :  { %544 = vmatprep.subr.bf16.mxu0 %v699_v49 }
  0x3f   :  { %545 = vmatpush3.bf16.msra.mxu0 %v586_v58 }
  0x40   :  { %546 = vmatprep.subr.bf16.mxu0 %v699_v49 }
  0x41   :  { %513 = vmatmul.mubr.msk.bf16.gmra.mxu0 %vm137_vm0, %v576_v11  ;;  %516 = vmatmul.mubr.msk.bf16.gmra.mxu1 %vm137_vm0, %v576_v11 }
  0x42   :  { %554 = vmatprep.mubr.msk.bf16.mxu0 %vm700_vm1, %v699_v49 }
  0x43   :  { %547 = vmatpush3.bf16.msra.mxu0 %v587_v60 }
  0x44   :  { %548 = vmatprep.subr.bf16.mxu0 %v699_v49 }
  0x47   :  { %549 = vmatpush3.bf16.msra.mxu0 %v588_v61 }
  0x48   :  { %550 = vmatprep.subr.bf16.mxu0 %v699_v49 }
  0x4b   :  { %551 = vmatpush3.bf16.msra.mxu0 %v589_v62 }
  0x4c   :  { %552 = vmatprep.subr.bf16.mxu0 %v699_v49  ;;  %v519_v49 = vld [vmem:[%s793_s4] ss:$0 sm:$0xff] }
  0x4f   :  { %553 = vmatpush3.bf16.msra.mxu0 %v590_v63 }
  0xf1   :  { %v181_v13 = vpop.f32.mrf.mxu0  ;;  %v240_v19 = vpop.f32.mrf.mxu1 }
  0xf2   :  { %v268_v14 = vadd.f32 %v517_v12, %v181_v13 }
  0xf3   :  { %v759_v15 = vpop.f32.mrf.mxu0  ;;  %v241_v21 = vpop.f32.mrf.mxu1 }
  0xf4   :  { %591 = vtanh.f32 %v268_v14 }
  0xf5   :  { %v185_v16 = vpop.f32.mrf.mxu0  ;;  %v242_v24 = vpop.f32.mrf.mxu1 }
  0xf6   :  { %v269_v17 = vadd.f32 %v517_v12, %v185_v16 }
  0xf7   :  { %v761_v18 = vpop.f32.mrf.mxu0  ;;  %v243_v26 = vpop.f32.mrf.mxu1 }
  0xf8   :  { %593 = vtanh.f32 %v269_v17 }
  0xf9   :  { %v191_v20 = vpop.f32.mrf.mxu0  ;;  %v766_v50 = vpop.f32.mrf.mxu1 }
  0xfa   :  { %v270_v22 = vadd.f32 %v517_v12, %v191_v20 }
  0xfb   :  { %v193_v23 = vpop.f32.mrf.mxu0  ;;  %v248_v51 = vpop.f32.mrf.mxu1 }
  0xfc   :  { %595 = vtanh.f32 %v270_v22 }
  0xfd   :  { %v194_v25 = vpop.f32.mrf.mxu0  ;;  %v768_v53 = vpop.f32.mrf.mxu1 }
  0xfe   :  { %v271_v27 = vadd.f32 %v517_v12, %v194_v25 }
  0xff   :  { %v196_v28 = vpop.f32.mrf.mxu0  ;;  %v251_v54 = vpop.f32.mrf.mxu1 }
 0x100   :  { %597 = vtanh.f32 %v271_v27 }
 0x101   :  { %v592_v30 = vpop.eup %591  ;;  %v199_v31 = vpop.f32.mrf.mxu0 }
 0x102   :  { %v272_v32 = vadd.f32 %v517_v12, %v199_v31  ;;  %v287_v33 = vmul.f32 %v592_v30, %v518_v29  ;;  %v254_v56 = vpop.f32.mrf.mxu1 }
 0x103   :  { %v201_v34 = vpop.f32.mrf.mxu0 }
 0x104   :  { %599 = vtanh.f32 %v272_v32  ;;  %293 = vadd.xlane.f32.xlu0 %v287_v33  ;;  %v770_v57 = vpop.f32.mrf.mxu1 }
 0x105   :  { %v594_v35 = vpop.eup %593  ;;  %v202_v36 = vpop.f32.mrf.mxu0 }
 0x106   :  { %v273_v37 = vadd.f32 %v517_v12, %v202_v36  ;;  %v288_v38 = vmul.f32 %v594_v35, %v518_v29  ;;  %v257_v59 = vpop.f32.mrf.mxu1 }
 0x107   :  { %v204_v39 = vpop.f32.mrf.mxu0 }
 0x108   :  { %601 = vtanh.f32 %v273_v37  ;;  %295 = vadd.xlane.f32.xlu0 %v288_v38  ;;  %v258_v51 = vpop.f32.mrf.mxu1 }
 0x109   :  { %v596_v40 = vpop.eup %595 }
 0x10a   :  { %v289_v41 = vmul.f32 %v596_v40, %v518_v29 }
 0x10c   :  { %297 = vadd.xlane.f32.xlu1 %v289_v41 }
 0x10d   :  { %v598_v42 = vpop.eup %597 }
 0x10e   :  { %v290_v43 = vmul.f32 %v598_v42, %v518_v29 }
 0x110   :  { %299 = vadd.xlane.f32.xlu1 %v290_v43 }
 0x111   :  { %v600_v44 = vpop.eup %599 }
 0x112   :  { %v291_v45 = vmul.f32 %v600_v44, %v518_v29 }
 0x114   :  { %301 = vadd.xlane.f32.xlu0 %v291_v45 }
 0x115   :  { %v602_v46 = vpop.eup %601 }
 0x116   :  { %v292_v47 = vmul.f32 %v602_v46, %v518_v29 }
 0x118   :  { %303 = vadd.xlane.f32.xlu1 %v292_v47 }
 0x18d   :  { %v294_v0 = vpop.xlane.xlu0 %293 }
 0x191   :  { %v296_v2 = vpop.xlane.xlu0 %295 }
 0x195   :  { %v298_v1 = vpop.xlane.xlu1 %297 }
 0x196   :  { %v305_v3 = vmax.f32 %v294_v0, %v298_v1 }
 0x199   :  { %v300_v4 = vpop.xlane.xlu1 %299 }
 0x19a   :  { %v306_v7 = vmax.f32 %v296_v2, %v300_v4 }
 0x19d   :  { %v302_v5 = vpop.xlane.xlu0 %301 }
 0x19e   :  { %v307_v6 = vmax.f32 %v305_v3, %v302_v5 }
 0x1a0   :  { %v309_v8 = vsub.f32 %v294_v0, %v307_v6  ;;  %v315_v9 = vsub.f32 %v298_v1, %v307_v6  ;;  %v321_v10 = vsub.f32 %v302_v5, %v307_v6 }
 0x1a1   :  { %v304_v11 = vpop.xlane.xlu1 %303 }
 0x1a2   :  { %v311_v12 = vmul.f32 1.442695, %v309_v8  ;;  %v317_v13 = vmul.f32 1.442695, %v315_v9  ;;  %v308_v14 = vmax.f32 %v306_v7, %v304_v11  ;;  %v323_v16 = vmul.f32 1.442695, %v321_v10 }
 0x1a4   :  { %603 = vpow2.f32 %v311_v12  ;;  %v310_v17 = vsub.f32 %v296_v2, %v308_v14  ;;  %v316_v19 = vsub.f32 %v300_v4, %v308_v14  ;;  %v322_v20 = vsub.f32 %v304_v11, %v308_v14 }
 0x1a5   :  { %605 = vpow2.f32 %v317_v13 }
 0x1a6   :  { %v313_v21 = vmul.f32 1.442695, %v310_v17  ;;  %v319_v22 = vmul.f32 1.442695, %v316_v19  ;;  %607 = vpow2.f32 %v323_v16  ;;  %v325_v23 = vmul.f32 1.442695, %v322_v20 }
 0x1a8   :  { %609 = vpow2.f32 %v313_v21 }
 0x1a9   :  { %611 = vpow2.f32 %v319_v22 }
 0x1aa   :  { %613 = vpow2.f32 %v325_v23 }
 0x1b1   :  { %v604_v24 = vpop.eup %603 }
 0x1b2   :  { %v606_v25 = vpop.eup %605 }
 0x1b3   :  { %v327_v26 = vadd.f32 %v606_v25, %v604_v24  ;;  %v608_v27 = vpop.eup %607 }
 0x1b5   :  { %v610_v28 = vpop.eup %609  ;;  %v329_v29 = vadd.f32 %v608_v27, %v327_v26 }
 0x1b6   :  { %v612_v30 = vpop.eup %611 }
 0x1b7   :  { %615 = vrcp.f32 %v329_v29  ;;  %v328_v31 = vadd.f32 %v612_v30, %v610_v28  ;;  %v614_v32 = vpop.eup %613 }
 0x1b9   :  { %v330_v33 = vadd.f32 %v614_v32, %v328_v31 }
 0x1bb   :  { %617 = vrcp.f32 %v330_v33 }
 0x1c4   :  { %v616_v34 = vpop.eup %615 }
 0x1c5   :  { %v333_v35 = vmul.f32 %v616_v34, %v604_v24  ;;  %v335_v36 = vmul.f32 %v616_v34, %v606_v25  ;;  %v337_v37 = vmul.f32 %v616_v34, %v608_v27 }
 0x1c7   :  { %v339_v38 = vmul.f32 %v333_v35, %v759_v15  ;;  %v341_v39 = vmul.f32 %v335_v36, %v766_v50  ;;  %v345_v41 = vmul.f32 %v337_v37, %v770_v57 }
 0x1c8   :  { %v618_v40 = vpop.eup %617 }
 0x1c9   :  { %v343_v42 = vadd.f32 %v341_v39, %v339_v38  ;;  %v334_v43 = vmul.f32 %v618_v40, %v610_v28  ;;  %v336_v44 = vmul.f32 %v618_v40, %v612_v30  ;;  %v338_v45 = vmul.f32 %v618_v40, %v614_v32 }
 0x1cb   :  { %v340_v46 = vmul.f32 %v334_v43, %v761_v18  ;;  %v342_v47 = vmul.f32 %v336_v44, %v768_v53  ;;  %v347_v48 = vadd.f32 %v345_v41, %v343_v42  ;;  %v346_v52 = vmul.f32 %v338_v45, %v258_v51  ;;  %v520_v18 = vld [vmem:[%s795_s6] ss:$0 sm:$0xff] }
 0x1cd   :  { %v344_v15 = vadd.f32 %v342_v47, %v340_v46  ;;  %v356_v50 = vadd.f32 %v519_v49, %v347_v48 }
 0x1cf   :  { %v348_v54 = vadd.f32 %v346_v52, %v344_v15  ;;  %v358_v56 = vmax.f32 %v356_v50, 0.0 }
 0x1d1   :  { %v357_v55 = vadd.f32 %v519_v49, %v348_v54 }
 0x1d3   :  { %v359_v57 = vmax.f32 %v357_v55, 0.0 }
 0x1d5   :  { %v360_v58 = vpack.c.bf16 %v359_v57, %v358_v56 }
 0x1d7   :  { %555 = vmatmul.mubr.bf16.vlgmr.msra.gmra.mxu0 %v360_v58 }
 0x297   :  { %v466_v53 = vpop.f32.mrf.mxu0 }
 0x298   :  { %v467_v59 = vadd.f32 %v520_v18, %v466_v53 }
 0x299   :  { %v556_v60 = vpop.f32.mrf.mxu0 }
 0x29a   :  { %473 = vmax.xlane.f32.xlu0 %v467_v59 }
 0x29b   :  { %v469_v61 = vpop.f32.mrf.mxu0 }
 0x29c   :  { %v470_v62 = vadd.f32 %v520_v18, %v469_v61 }
 0x29d   :  { %v557_v63 = vpop.f32.mrf.mxu0 }
 0x29e   :  { %475 = vmax.xlane.f32.xlu1 %v470_v62 }
 0x323   :  { %v474_v0 = vpop.xlane.xlu0 %473 }
 0x324   :  { %v477_v1 = vsub.f32 %v467_v59, %v474_v0 }
 0x326   :  { %v479_v2 = vmul.f32 1.442695, %v477_v1 }
 0x327   :  { %v476_v3 = vpop.xlane.xlu1 %475 }
 0x328   :  { %619 = vpow2.f32 %v479_v2  ;;  %v478_v4 = vsub.f32 %v470_v62, %v476_v3 }
 0x32a   :  { %v481_v5 = vmul.f32 1.442695, %v478_v4 }
 0x32c   :  { %621 = vpow2.f32 %v481_v5 }
 0x335   :  { %v620_v6 = vpop.eup %619 }
 0x336   :  { %483 = vadd.xlane.f32.xlu0 %v620_v6 }
 0x339   :  { %v622_v7 = vpop.eup %621 }
 0x33a   :  { %485 = vadd.xlane.f32.xlu1 %v622_v7 }
 0x3bf   :  { %v484_v8 = vpop.xlane.xlu0 %483 }
 0x3c0   :  { %623 = vrcp.f32 %v484_v8 }
 0x3c3   :  { %v486_v9 = vpop.xlane.xlu1 %485 }
 0x3c4   :  { %625 = vrcp.f32 %v486_v9 }
 0x3cd   :  { %v624_v10 = vpop.eup %623 }
 0x3ce   :  { %v489_v11 = vmul.f32 %v624_v10, %v620_v6 }
 0x3d0   :  { %492 = vst.msk [vmem:[%s796_s7] sm:$0xff] %vm491_vm2, %v489_v11 }
 0x3d1   :  { %v626_v12 = vpop.eup %625 }
 0x3d2   :  { %v490_v13 = vmul.f32 %v626_v12, %v622_v7 }
 0x3d4   :  { %493 = vst.msk [vmem:[%s796_s7 + $0x8] sm:$0xff] %vm491_vm2, %v490_v13 }
 0x3d5   :  { %498 = vsyncpa [#allocation3], 1 }
 0x3d6   :  { %499 = vsyncpa [#allocation5], 1 }

</bundles_post_ra>
